<compile_context>
chip_gen: v5e
topology: v5e:2x2
jax: 0.10.0
libtpu: 0.0.40
codegen_flags: <defaults>
</compile_context>

<pallas_src>
import functools

import jax
import jax.numpy as jnp
from jax.experimental import pallas as pl
from jax.experimental.pallas import tpu as pltpu

LANE = 128
SUBLANE_BF16 = 16  # bf16 sublane packing -> batch tiles are multiples of 16


def _round_up(n, m):
    return ((n + m - 1) // m) * m


# ---------------------------------------------------------------------------
# Kernel body: full 5-layer MLP on one (batch_tile, *) row tile.
# Weights/biases are grid-invariant VMEM residents.
# ---------------------------------------------------------------------------
def mlp_kernel(x_ref,
               w1_ref, b1_ref, w2_ref, b2_ref, w3_ref, b3_ref,
               w4_ref, b4_ref, w5_ref, b5_ref,
               o_ref):
    def layer(h, w_ref, b_ref, relu):
        # MXU matmul: bf16 operands, f32 accumulation.
        acc = jnp.dot(h, w_ref[...], preferred_element_type=jnp.float32)
        acc = acc + b_ref[...]                # bias add in f32
        if relu:
            acc = jnp.maximum(acc, 0.0)       # ReLU in f32 (v5e VPU has no bf16)
            return acc.astype(w_ref.dtype)    # back to compute dtype for next MXU
        return acc                            # final layer stays f32 until store

    h = x_ref[...]                            # bf16, no upcast
    h = layer(h, w1_ref, b1_ref, True)
    h = layer(h, w2_ref, b2_ref, True)
    h = layer(h, w3_ref, b3_ref, True)
    h = layer(h, w4_ref, b4_ref, True)
    out = layer(h, w5_ref, b5_ref, False)
    o_ref[...] = out.astype(o_ref.dtype)      # bf16 lane-dense store


# ---------------------------------------------------------------------------
# One-time hardware / capability queries (cached per process).
# ---------------------------------------------------------------------------
@functools.lru_cache(maxsize=None)
def _vmem_capacity_bytes():
    try:
        return int(pltpu.get_tpu_info().vmem_capacity_bytes)
    except Exception:
        return 64 * 1024 * 1024  # conservative default (v7x per-TC VMEM)


@functools.lru_cache(maxsize=None)
def _num_tensorcores():
    """1 on single-TC chips (v5e/v6e/v2), 2 on megacore / dual-TC chips."""
    try:
        kind = jax.devices()[0].device_kind.lower()
    except Exception:
        return 2
    if "lite" in kind or "v5e" in kind or "v6" in kind or "v2" in kind:
        return 1
    return 2


@functools.lru_cache(maxsize=None)
def _single_buffer_weights_supported():
    """Probe once whether pl.Buffered(1) specs lower/compile on this install."""
    def _k(w_ref, x_ref, o_ref):
        o_ref[...] = x_ref[...] + w_ref[...]

    try:
        spec_w = pl.BlockSpec((8, LANE), lambda i: (0, 0),
                              pipeline_mode=pl.Buffered(1))
        fn = pl.pallas_call(
            _k,
            out_shape=jax.ShapeDtypeStruct((16, LANE), jnp.float32),
            grid_spec=pltpu.PrefetchScalarGridSpec(
                num_scalar_prefetch=0,
                grid=(2,),
                in_specs=[spec_w, pl.BlockSpec((8, LANE), lambda i: (i, 0))],
                out_specs=pl.BlockSpec((8, LANE), lambda i: (i, 0))),
        )
        jax.jit(fn).lower(jax.ShapeDtypeStruct((8, LANE), jnp.float32),
                          jax.ShapeDtypeStruct((16, LANE), jnp.float32)).compile()
        return True
    except Exception:
        return False


# ---------------------------------------------------------------------------
# Parameter preparation (once, at construction): pad layer OUTPUT dims to 128
# lanes (zero padding is exact for Linear+ReLU), cast weights to compute dtype,
# keep biases in f32. The first-layer input dim stays unpadded.
# ---------------------------------------------------------------------------
def _prepare_params(params, compute_dtype):
    prepped = []
    prev_in = params["w1"].shape[0]
    for idx in range(1, 6):
        w = jnp.asarray(params[f"w{idx}"])
        b = jnp.asarray(params[f"b{idx}"]).reshape(1, -1)
        din, dout = w.shape
        din_p = prev_in
        dout_p = _round_up(dout, LANE)
        w_p = jnp.pad(w.astype(compute_dtype),
                      ((0, din_p - din), (0, dout_p - dout)))
        b_p = jnp.pad(b.astype(jnp.float32), ((0, 0), (0, dout_p - dout)))
        prepped.append((w_p, b_p))
        prev_in = dout_p
    return prepped


class NeuralUnitPallas:
    """Fused Pallas forward for the NeuralUnit 5-layer MLP.

        unit = NeuralUnitPallas(params)   # pads/casts params once
        y = unit(x)                       # jitted; compiled once per batch size
    """

    def __init__(self, params, *, compute_dtype=jnp.bfloat16, max_batch_tile=1024):
        self._compute_dtype = jnp.dtype(compute_dtype)
        self._max_batch_tile = int(max_batch_tile)
        self._in_dim = params["w1"].shape[0]
        self._out_dim = params["w5"].shape[1]
        prepped = _prepare_params(params, compute_dtype)
        self._flat_params = tuple(a for wb in prepped for a in wb)
        self._shapes = tuple((tuple(w.shape), tuple(b.shape)) for w, b in prepped)
        self._fns = {}

    def __call__(self, x):
        key = (int(x.shape[0]), jnp.dtype(x.dtype))
        fn = self._fns.get(key)
        if fn is None:
            fn = self._build(*key)
            self._fns[key] = fn
        return fn(x, *self._flat_params)

    # -- build the jitted forward for one (batch, dtype) configuration -------
    def _build(self, batch, x_dtype):
        cdt = self._compute_dtype
        isz = cdt.itemsize
        din = self._in_dim
        out_dim = self._out_dim
        out_p = self._shapes[-1][0][1]
        widths = [w_shape[1] for w_shape, _ in self._shapes]
        max_w = max(widths)

        single_buffer = _single_buffer_weights_supported()
        weight_bytes = sum(w[0] * w[1] * isz + b[0] * b[1] * 4
                           for w, b in self._shapes)
        weight_mult = 1 if single_buffer else 2

        vmem = _vmem_capacity_bytes()
        budget = int(vmem * 0.70)          # fit estimate headroom
        vmem_limit = int(vmem * 0.85)      # scoped VMEM limit for the compiler

        # Per-batch-row VMEM: double-buffered x / out tiles + live f32 acc and
        # bf16 activation for the widest layer.
        per_row = 2 * din * isz + 2 * out_p * isz + max_w * (2 * 4 + isz)

        # Grid: 1 step on single-TC chips; >= num_cores parallel steps otherwise.
        n_tc = _num_tensorcores()
        target_steps = n_tc if (n_tc > 1 and batch > SUBLANE_BF16 * n_tc) else 1
        tb = _round_up(pl.cdiv(batch, target_steps), SUBLANE_BF16)
        tb = min(tb, _round_up(self._max_batch_tile, SUBLANE_BF16))
        while tb > SUBLANE_BF16 and weight_mult * weight_bytes + tb * per_row > budget:
            tb = _round_up(tb // 2, SUBLANE_BF16)

        batch_p = _round_up(batch, tb)
        grid = (batch_p // tb,)
        pad_rows = batch_p - batch

        def weight_spec(shape):
            if single_buffer:
                # Grid-invariant blocks gain nothing from double-buffering.
                return pl.BlockSpec(shape, lambda i: (0, 0),
                                    pipeline_mode=pl.Buffered(1))
            return pl.BlockSpec(shape, lambda i: (0, 0))

        in_specs = [pl.BlockSpec((tb, din), lambda i: (i, 0))]
        for w_shape, b_shape in self._shapes:
            in_specs.append(weight_spec(w_shape))
            in_specs.append(weight_spec(b_shape))

        flops = sum(2 * batch_p * w[0] * w[1] for w, _ in self._shapes)
        bytes_accessed = batch_p * din * isz + batch_p * out_p * isz + weight_bytes
        cost = pl.CostEstimate(flops=int(flops), transcendentals=0,
                               bytes_accessed=int(bytes_accessed))

        call = pl.pallas_call(
            mlp_kernel,
            out_shape=jax.ShapeDtypeStruct((batch_p, out_p), cdt),
            grid_spec=pltpu.PrefetchScalarGridSpec(
                num_scalar_prefetch=0,
                grid=grid,
                in_specs=in_specs,
                out_specs=pl.BlockSpec((tb, out_p), lambda i: (i, 0)),
            ),
            compiler_params=pltpu.CompilerParams(
                dimension_semantics=("parallel",),
                vmem_limit_bytes=vmem_limit,
            ),
            cost_estimate=cost,
        )

        def fwd(x, *wb):
            xc = x.astype(cdt)
            if pad_rows:
                xc = jnp.pad(xc, ((0, pad_rows), (0, 0)))
            y = call(xc, *wb)
            return y[:batch, :out_dim].astype(x_dtype)

        return jax.jit(fwd)


# ---------------------------------------------------------------------------
# Synthetic params + pure-JAX references (for the self-test below).
# ---------------------------------------------------------------------------
def init_params(key, input_dim, hidden_size, output_size):
    """Deterministic init matching the module's layer shapes (weights stored
    as (in, out), i.e. torch Linear weight transposed)."""
    dims = [(input_dim, hidden_size),
            (hidden_size, hidden_size),
            (hidden_size, hidden_size),
            (hidden_size, hidden_size),
            (hidden_size, output_size)]
    params = {}
    for idx, (din, dout) in enumerate(dims, start=1):
        key, kw, kb = jax.random.split(key, 3)
        scale = 1.0 / jnp.sqrt(jnp.float32(din))
        params[f"w{idx}"] = jax.random.uniform(kw, (din, dout), jnp.float32, -scale, scale)
        params[f"b{idx}"] = jax.random.uniform(kb, (1, dout), jnp.float32, -scale, scale)
    return params


def reference_forward_f32(x, params):
    """Original-module (full f32) arithmetic."""
    h = x
    for idx in range(1, 5):
        h = jnp.maximum(h @ params[f"w{idx}"] + params[f"b{idx}"], 0.0)
    return h @ params["w5"] + params["b5"]


def reference_forward_bf16(x, params):
    """Same bf16-operand / f32-accumulate / bf16-output arithmetic as the kernel."""
    h = x.astype(jnp.bfloat16)
    for idx in range(1, 5):
        w = params[f"w{idx}"].astype(jnp.bfloat16)
        acc = jnp.dot(h, w, preferred_element_type=jnp.float32) + params[f"b{idx}"]
        h = jnp.maximum(acc, 0.0).astype(jnp.bfloat16)
    w5 = params["w5"].astype(jnp.bfloat16)
    out = jnp.dot(h, w5, preferred_element_type=jnp.float32) + params["b5"]
    return out.astype(jnp.bfloat16).astype(jnp.float32)


if __name__ == "__main__":
    # Module defaults: hidden_size=128, output_size=32; input_dim=dim_dict[node]
    # (16 here). batch=256 so dual-TC chips get 2 parallel 128-row tiles while
    # single-TC chips run one 256-row tile.
    batch, input_dim, hidden_size, output_size = 256, 16, 128, 32

    key = jax.random.PRNGKey(0)
    key, kx = jax.random.split(key)
    x = jax.random.normal(kx, (batch, input_dim), jnp.float32)
    params = init_params(key, input_dim, hidden_size, output_size)

    unit = NeuralUnitPallas(params)          # params padded/cast once here
    out = jax.block_until_ready(unit(x))     # first call compiles the jitted fwd
    assert out.shape == (batch, output_size)
    assert out.dtype == x.dtype

    ref_bf16 = reference_forward_bf16(x, params)   # same arithmetic as kernel
    ref_f32 = reference_forward_f32(x, params)     # original module arithmetic
    assert jnp.allclose(out, ref_bf16, atol=2e-2, rtol=2e-2), "mismatch vs bf16 reference"
    assert jnp.allclose(out, ref_f32, atol=5e-2, rtol=5e-2), "mismatch vs f32 reference"

    # Second call: cached jitted function, no re-trace / probe / host sync.
    out2 = jax.block_until_ready(unit(x))
    assert jnp.array_equal(out, out2)

    print("KERNEL_OK")
</pallas_src>

<mosaic_0001>
module attributes {stable_mosaic.version = 11 : i64} {
  func.func @mlp_kernel(%arg0: i32, %arg1: memref<128x16xbf16, #tpu.memory_space<vmem>>, %arg2: memref<16x128xbf16, #tpu.memory_space<vmem>>, %arg3: memref<1x128xf32, #tpu.memory_space<vmem>>, %arg4: memref<128x128xbf16, #tpu.memory_space<vmem>>, %arg5: memref<1x128xf32, #tpu.memory_space<vmem>>, %arg6: memref<128x128xbf16, #tpu.memory_space<vmem>>, %arg7: memref<1x128xf32, #tpu.memory_space<vmem>>, %arg8: memref<128x128xbf16, #tpu.memory_space<vmem>>, %arg9: memref<1x128xf32, #tpu.memory_space<vmem>>, %arg10: memref<128x128xbf16, #tpu.memory_space<vmem>>, %arg11: memref<1x128xf32, #tpu.memory_space<vmem>>, %arg12: memref<128x128xbf16, #tpu.memory_space<vmem>>) attributes {dimension_semantics = [#tpu.dimension_semantics<parallel>], iteration_bounds = array<i64: 2>, scalar_prefetch = 0 : i64, scratch_operands = 0 : i64, tpu.core_type = #tpu.core_type<tc>, window_params = [{transform_indices = @transform_0, window_bounds = array<i64: 128, 16>}, {pipeline_mode = #tpu.pipeline_mode<synchronous>, transform_indices = @transform_1, window_bounds = array<i64: 16, 128>}, {pipeline_mode = #tpu.pipeline_mode<synchronous>, transform_indices = @transform_2, window_bounds = array<i64: 1, 128>}, {pipeline_mode = #tpu.pipeline_mode<synchronous>, transform_indices = @transform_3, window_bounds = array<i64: 128, 128>}, {pipeline_mode = #tpu.pipeline_mode<synchronous>, transform_indices = @transform_4, window_bounds = array<i64: 1, 128>}, {pipeline_mode = #tpu.pipeline_mode<synchronous>, transform_indices = @transform_5, window_bounds = array<i64: 128, 128>}, {pipeline_mode = #tpu.pipeline_mode<synchronous>, transform_indices = @transform_6, window_bounds = array<i64: 1, 128>}, {pipeline_mode = #tpu.pipeline_mode<synchronous>, transform_indices = @transform_7, window_bounds = array<i64: 128, 128>}, {pipeline_mode = #tpu.pipeline_mode<synchronous>, transform_indices = @transform_8, window_bounds = array<i64: 1, 128>}, {pipeline_mode = #tpu.pipeline_mode<synchronous>, transform_indices = @transform_9, window_bounds = array<i64: 128, 128>}, {pipeline_mode = #tpu.pipeline_mode<synchronous>, transform_indices = @transform_10, window_bounds = array<i64: 1, 128>}, {transform_indices = @transform_11, window_bounds = array<i64: 128, 128>}]} {
    %c0 = arith.constant 0 : index
    %c0_0 = arith.constant 0 : index
    %0 = vector.load %arg1[%c0, %c0_0] : memref<128x16xbf16, #tpu.memory_space<vmem>>, vector<128x16xbf16>
    %c0_1 = arith.constant 0 : index
    %c0_2 = arith.constant 0 : index
    %1 = vector.load %arg2[%c0_1, %c0_2] : memref<16x128xbf16, #tpu.memory_space<vmem>>, vector<16x128xbf16>
    %cst = arith.constant dense<0.000000e+00> : vector<128x128xf32>
    %2 = tpu.matmul %0, %1, %cst {dimension_numbers = #tpu.dot_dimension_numbers<[1], [0], [0], [1], [0, 0, 1, 1], [], []>} : vector<128x16xbf16>, vector<16x128xbf16>, vector<128x128xf32> -> vector<128x128xf32>
    %c0_3 = arith.constant 0 : index
    %c0_4 = arith.constant 0 : index
    %3 = vector.load %arg3[%c0_3, %c0_4] : memref<1x128xf32, #tpu.memory_space<vmem>>, vector<1x128xf32>
    %4 = vector.broadcast %3 : vector<1x128xf32> to vector<128x128xf32>
    %5 = arith.addf %2, %4 : vector<128x128xf32>
    %cst_5 = arith.constant 0.000000e+00 : f32
    %6 = vector.broadcast %cst_5 : f32 to vector<128x128xf32>
    %7 = arith.maximumf %5, %6 : vector<128x128xf32>
    %8 = arith.truncf %7 : vector<128x128xf32> to vector<128x128xbf16>
    %c0_6 = arith.constant 0 : index
    %c0_7 = arith.constant 0 : index
    %9 = vector.load %arg4[%c0_6, %c0_7] : memref<128x128xbf16, #tpu.memory_space<vmem>>, vector<128x128xbf16>
    %cst_8 = arith.constant dense<0.000000e+00> : vector<128x128xf32>
    %10 = tpu.matmul %8, %9, %cst_8 {dimension_numbers = #tpu.dot_dimension_numbers<[1], [0], [0], [1], [0, 0, 1, 1], [], []>} : vector<128x128xbf16>, vector<128x128xbf16>, vector<128x128xf32> -> vector<128x128xf32>
    %c0_9 = arith.constant 0 : index
    %c0_10 = arith.constant 0 : index
    %11 = vector.load %arg5[%c0_9, %c0_10] : memref<1x128xf32, #tpu.memory_space<vmem>>, vector<1x128xf32>
    %12 = vector.broadcast %11 : vector<1x128xf32> to vector<128x128xf32>
    %13 = arith.addf %10, %12 : vector<128x128xf32>
    %cst_11 = arith.constant 0.000000e+00 : f32
    %14 = vector.broadcast %cst_11 : f32 to vector<128x128xf32>
    %15 = arith.maximumf %13, %14 : vector<128x128xf32>
    %16 = arith.truncf %15 : vector<128x128xf32> to vector<128x128xbf16>
    %c0_12 = arith.constant 0 : index
    %c0_13 = arith.constant 0 : index
    %17 = vector.load %arg6[%c0_12, %c0_13] : memref<128x128xbf16, #tpu.memory_space<vmem>>, vector<128x128xbf16>
    %cst_14 = arith.constant dense<0.000000e+00> : vector<128x128xf32>
    %18 = tpu.matmul %16, %17, %cst_14 {dimension_numbers = #tpu.dot_dimension_numbers<[1], [0], [0], [1], [0, 0, 1, 1], [], []>} : vector<128x128xbf16>, vector<128x128xbf16>, vector<128x128xf32> -> vector<128x128xf32>
    %c0_15 = arith.constant 0 : index
    %c0_16 = arith.constant 0 : index
    %19 = vector.load %arg7[%c0_15, %c0_16] : memref<1x128xf32, #tpu.memory_space<vmem>>, vector<1x128xf32>
    %20 = vector.broadcast %19 : vector<1x128xf32> to vector<128x128xf32>
    %21 = arith.addf %18, %20 : vector<128x128xf32>
    %cst_17 = arith.constant 0.000000e+00 : f32
    %22 = vector.broadcast %cst_17 : f32 to vector<128x128xf32>
    %23 = arith.maximumf %21, %22 : vector<128x128xf32>
    %24 = arith.truncf %23 : vector<128x128xf32> to vector<128x128xbf16>
    %c0_18 = arith.constant 0 : index
    %c0_19 = arith.constant 0 : index
    %25 = vector.load %arg8[%c0_18, %c0_19] : memref<128x128xbf16, #tpu.memory_space<vmem>>, vector<128x128xbf16>
    %cst_20 = arith.constant dense<0.000000e+00> : vector<128x128xf32>
    %26 = tpu.matmul %24, %25, %cst_20 {dimension_numbers = #tpu.dot_dimension_numbers<[1], [0], [0], [1], [0, 0, 1, 1], [], []>} : vector<128x128xbf16>, vector<128x128xbf16>, vector<128x128xf32> -> vector<128x128xf32>
    %c0_21 = arith.constant 0 : index
    %c0_22 = arith.constant 0 : index
    %27 = vector.load %arg9[%c0_21, %c0_22] : memref<1x128xf32, #tpu.memory_space<vmem>>, vector<1x128xf32>
    %28 = vector.broadcast %27 : vector<1x128xf32> to vector<128x128xf32>
    %29 = arith.addf %26, %28 : vector<128x128xf32>
    %cst_23 = arith.constant 0.000000e+00 : f32
    %30 = vector.broadcast %cst_23 : f32 to vector<128x128xf32>
    %31 = arith.maximumf %29, %30 : vector<128x128xf32>
    %32 = arith.truncf %31 : vector<128x128xf32> to vector<128x128xbf16>
    %c0_24 = arith.constant 0 : index
    %c0_25 = arith.constant 0 : index
    %33 = vector.load %arg10[%c0_24, %c0_25] : memref<128x128xbf16, #tpu.memory_space<vmem>>, vector<128x128xbf16>
    %cst_26 = arith.constant dense<0.000000e+00> : vector<128x128xf32>
    %34 = tpu.matmul %32, %33, %cst_26 {dimension_numbers = #tpu.dot_dimension_numbers<[1], [0], [0], [1], [0, 0, 1, 1], [], []>} : vector<128x128xbf16>, vector<128x128xbf16>, vector<128x128xf32> -> vector<128x128xf32>
    %c0_27 = arith.constant 0 : index
    %c0_28 = arith.constant 0 : index
    %35 = vector.load %arg11[%c0_27, %c0_28] : memref<1x128xf32, #tpu.memory_space<vmem>>, vector<1x128xf32>
    %36 = vector.broadcast %35 : vector<1x128xf32> to vector<128x128xf32>
    %37 = arith.addf %34, %36 : vector<128x128xf32>
    %38 = arith.truncf %37 : vector<128x128xf32> to vector<128x128xbf16>
    %c0_29 = arith.constant 0 : index
    %c0_30 = arith.constant 0 : index
    %39 = vector.load %arg12[%c0_29, %c0_30] : memref<128x128xbf16, #tpu.memory_space<vmem>>, vector<128x128xbf16>
    tpu.vector_store %arg12[%c0_29, %c0_30], %38 {strides = array<i32>} : memref<128x128xbf16, #tpu.memory_space<vmem>>, vector<128x128xbf16>,
    return
  }
  func.func @transform_0(%arg0: i32) -> (i32, i32) {
    %c0_i32 = arith.constant 0 : i32
    %c0_i32_0 = arith.constant 0 : i32
    return %arg0, %c0_i32 : i32, i32
  }
  func.func @transform_1(%arg0: i32) -> (i32, i32) {
    %c0_i32 = arith.constant 0 : i32
    %c0_i32_0 = arith.constant 0 : i32
    %c0_i32_1 = arith.constant 0 : i32
    return %c0_i32, %c0_i32_0 : i32, i32
  }
  func.func @transform_2(%arg0: i32) -> (i32, i32) {
    %c0_i32 = arith.constant 0 : i32
    %c0_i32_0 = arith.constant 0 : i32
    %c0_i32_1 = arith.constant 0 : i32
    return %c0_i32, %c0_i32_0 : i32, i32
  }
  func.func @transform_3(%arg0: i32) -> (i32, i32) {
    %c0_i32 = arith.constant 0 : i32
    %c0_i32_0 = arith.constant 0 : i32
    %c0_i32_1 = arith.constant 0 : i32
    return %c0_i32, %c0_i32_0 : i32, i32
  }
  func.func @transform_4(%arg0: i32) -> (i32, i32) {
    %c0_i32 = arith.constant 0 : i32
    %c0_i32_0 = arith.constant 0 : i32
    %c0_i32_1 = arith.constant 0 : i32
    return %c0_i32, %c0_i32_0 : i32, i32
  }
  func.func @transform_5(%arg0: i32) -> (i32, i32) {
    %c0_i32 = arith.constant 0 : i32
    %c0_i32_0 = arith.constant 0 : i32
    %c0_i32_1 = arith.constant 0 : i32
    return %c0_i32, %c0_i32_0 : i32, i32
  }
  func.func @transform_6(%arg0: i32) -> (i32, i32) {
    %c0_i32 = arith.constant 0 : i32
    %c0_i32_0 = arith.constant 0 : i32
    %c0_i32_1 = arith.constant 0 : i32
    return %c0_i32, %c0_i32_0 : i32, i32
  }
  func.func @transform_7(%arg0: i32) -> (i32, i32) {
    %c0_i32 = arith.constant 0 : i32
    %c0_i32_0 = arith.constant 0 : i32
    %c0_i32_1 = arith.constant 0 : i32
    return %c0_i32, %c0_i32_0 : i32, i32
  }
  func.func @transform_8(%arg0: i32) -> (i32, i32) {
    %c0_i32 = arith.constant 0 : i32
    %c0_i32_0 = arith.constant 0 : i32
    %c0_i32_1 = arith.constant 0 : i32
    return %c0_i32, %c0_i32_0 : i32, i32
  }
  func.func @transform_9(%arg0: i32) -> (i32, i32) {
    %c0_i32 = arith.constant 0 : i32
    %c0_i32_0 = arith.constant 0 : i32
    %c0_i32_1 = arith.constant 0 : i32
    return %c0_i32, %c0_i32_0 : i32, i32
  }
  func.func @transform_10(%arg0: i32) -> (i32, i32) {
    %c0_i32 = arith.constant 0 : i32
    %c0_i32_0 = arith.constant 0 : i32
    %c0_i32_1 = arith.constant 0 : i32
    return %c0_i32, %c0_i32_0 : i32, i32
  }
  func.func @transform_11(%arg0: i32) -> (i32, i32) {
    %c0_i32 = arith.constant 0 : i32
    %c0_i32_0 = arith.constant 0 : i32
    return %arg0, %c0_i32 : i32, i32
  }
}

</mosaic_0001>

<bundles_post_ra>
// kernel: fwd.1
= control target key start
LH: loop header
LB: loop body
LE: loop exit
PB: predicated region body
PF: predicated region fallthrough
CT: control target
= control target key end

     0   :  { %16 = vsyncpa [#allocation3], 0  ;;  %s1982_s0 = inlined_call_operand.vmem [shape: bf16[256,16], index: 0, kind: input, shape index: {}]   ;;  %s1983_s1 = inlined_call_operand.hbm [shape: bf16[16,128], index: 1, kind: input, shape index: {}]   ;;  %s1984_s2 = inlined_call_operand.hbm [shape: f32[1,128], index: 2, kind: input, shape index: {}]   ;;  %s1985_s3 = inlined_call_operand.vmem [shape: bf16[128,128], index: 3, kind: input, shape index: {}]   ;;  %s1986_s4 = inlined_call_operand.vmem [shape: f32[1,128], index: 4, kind: input, shape index: {}]   ;;  %s1987_s5 = inlined_call_operand.vmem [shape: bf16[128,128], index: 5, kind: input, shape index: {}]   ;;  %s1988_s6 = inlined_call_operand.vmem [shape: f32[1,128], index: 6, kind: input, shape index: {}]   ;;  %s1989_s7 = inlined_call_operand.vmem [shape: bf16[128,128], index: 7, kind: input, shape index: {}]   ;;  %s1990_s8 = inlined_call_operand.vmem [shape: f32[1,128], index: 8, kind: input, shape index: {}]   ;;  %s1991_s9 = inlined_call_operand.hbm [shape: bf16[128,128], index: 9, kind: input, shape index: {}]   ;;  %s1992_s10 = inlined_call_operand.vmem [shape: f32[1,128], index: 10, kind: input, shape index: {}]   ;;  %s1993_s11 = inlined_call_operand.vmem [shape: bf16[256,128], index: 11, kind: output, shape index: {}]  }
   0x1   :  { %17 = vsyncpa [#allocation5], 0  ;;  %s1761_s17 = smov 0  }
   0x2 LB: > { %s316_s20 = sshll.u32 %s1984_s2, 4  ;;  %s1264_s21 = sadd.s32 4294967295, %s1694_s17   ;;  %s1694_s17 = sphi %s1761_s17, %s23_s17   ;;  %s317_s20 = int_to_ptr.hbm [resolvable:$true] %s316_s20 }
   0x3   : > { %p1266_p0 = scmp.ge.s32.totalorder %s1694_s17, 1  ;;  %p290_p1 = scmp.lt.s32.totalorder %s1694_s17, 3 }
   0x4   : > { %p1772_p2 = scmp.eq.s32.totalorder %s1264_s21, 0  ;;  %s1696_s24 = smov [#allocation4]  }
   0x5   : > { %p1776_p3 = pnand %p1266_p0, %p290_p1  ;;  %s318_s25 = sshll.u32 %s1696_s24, 4  ;;  %s319_s25 = int_to_ptr.vmem [resolvable:$true] %s318_s25 }
   0x6   : > { %s301_s28 = sshll.u32 %s1983_s1, 4  ;;  %s1697_s29 = smov [#allocation2]   ;;  %s302_s28 = int_to_ptr.hbm [resolvable:$true] %s301_s28 }
   0x7   : > { %p1556_p4 = pneg %p1776_p3  ;;  %s303_s30 = sshll.u32 %s1697_s29, 4  ;;  %s304_s30 = int_to_ptr.vmem [resolvable:$true] %s303_s30 }
   0x8   : > { %s345_s14 = sshll.u32 %s1991_s9, 4  ;;  %s1698_s15 = smov 64   ;;  %s346_s14 = int_to_ptr.hbm [resolvable:$true] %s345_s14 }
   0x9   : > { %p1557_p5 = pnand %p1772_p2, %p1556_p4  ;;  %s1699_s16 = smov 4  }
   0xa   : > { %s1700_s18 = smov [#allocation6]   ;;  %375 = sbr.rel (%p1776_p3) target bundleno = 848 (0x350), region = 64 }
   0xb   : > { %1562 = dma.hbm_to_vmem [thread:$0]  (!%p1557_p5), %s317_s20, 16, %s319_s25, [#allocation5]  }
   0xc   : > { %1559 = dma.hbm_to_vmem [thread:$0]  (!%p1557_p5), %s302_s28, 128, %s304_s30, [#allocation3], %s1698_s15, %s1698_s15, %s1699_s16  }
   0xd   : > { %s347_s19 = sshll.u32 %s1700_s18, 4  ;;  %s348_s19 = int_to_ptr.vmem [resolvable:$true] %s347_s19 }
   0xe   : > { %1565 = dma.hbm_to_vmem [thread:$0]  (!%p1557_p5), %s346_s14, 1024, %s348_s19, [#allocation5], %s1698_s15, %s1698_s15, %s1699_s16  }
   0xf   : > { %1685 = dma.done.wait (%p1772_p2), [#allocation3], 128  }
  0x10   : > { %1687 = vsyncadd (%p1772_p2), [#allocation3], 4294967168 }
  0x11   : > { %1689 = dma.done.wait (%p1772_p2), [#allocation5], 1040  }
  0x12   : > { %1691 = vsyncadd (%p1772_p2), [#allocation5], 4294966256  ;;  %s1275_s20 = sshll.u32 %s1264_s21, 4  ;;  %v1461_v0 = vld [vmem:[#allocation2] sm:$0xff]  ;;  %vm507_vm0 = vcmask 130048   ;;  %v1469_v5 = vld [vmem:[%s1985_s3 + $0x38] sm:$0xff] }
  0x13   : > { %p427_p6 = scmp.lt.s32.totalorder %s1275_s20, 31  ;;  %539 = vmatpush.bf16.msra.mxu0 %v1461_v0  ;;  %1541 = vmatpush.bf16.msra.mxu1 %v1461_v0  ;;  %v1468_v6 = vld [vmem:[%s1985_s3 + $0x30] sm:$0xff]  ;;  %v1467_v7 = vld [vmem:[%s1985_s3 + $0x28] sm:$0xff]  ;;  %v1466_v8 = vld [vmem:[%s1985_s3 + $0x20] sm:$0xff] }
  0x14   : > { %1542 = vmatpush.bf16.msra.mxu2 %v1461_v0  ;;  %1543 = vmatpush.bf16.msra.mxu3 %v1461_v0  ;;  %v1465_v12 = vld [vmem:[%s1985_s3 + $0x18] sm:$0xff]  ;;  %v1464_v14 = vld [vmem:[%s1985_s3 + $0x10] sm:$0xff]  ;;  %v1463_v15 = vld [vmem:[%s1985_s3 + $0x8] sm:$0xff] }
  0x15   : > { %s1997_s20 = smov (!%p427_p6, %s1275_s20), 31  ;;  %v1462_v16 = vld [vmem:[%s1985_s3] sm:$0xff]  ;;  %v1850_v18 = vld [vmem:[#allocation4] ss:$0 sm:$0xff]  ;;  %v1477_v48 = vld [vmem:[%s1987_s5 + $0x38] sm:$0xff] }
  0x16   : > { %s1276_s23 = sshll.u32 %s1997_s20, 2  ;;  %v1476_v56 = vld [vmem:[%s1987_s5 + $0x30] sm:$0xff]  ;;  %v1475_v57 = vld [vmem:[%s1987_s5 + $0x28] sm:$0xff]  ;;  %v1474_v60 = vld [vmem:[%s1987_s5 + $0x20] sm:$0xff] }
  0x17   : > { %s1808_s26 = scalar_lea.vmem %s1982_s0, %s1276_s23  ;;  %673 = vmatpush.bf16.msrb.mxu1 %v1469_v5  ;;  %s1969_s16 = scalar_lea.vmem %s1993_s11, %s1276_s23 }
  0x18   : > { %v1453_v1 = vld [vmem:[%s1808_s26] sm:$0xff]  ;;  %v1455_v2 = vld [vmem:[%s1808_s26 + $0x10] sm:$0xff]  ;;  %v1460_v4 = vld [vmem:[%s1808_s26 + $0x38] sm:$0xff]  ;;  %814 = vmatpush.bf16.msrb.mxu2 %v1477_v48 }
  0x19   : > { %v1457_v3 = vld [vmem:[%s1808_s26 + $0x20] sm:$0xff]  ;;  %1315 = vmatmul.msk.bf16.vlgmr.msra.gmra.mxu0 %vm507_vm0, %v1453_v1  ;;  %1317 = vmatmul.msk.bf16.vlgmr.msra.gmra.mxu1 %vm507_vm0, %v1455_v2  ;;  %v1454_v9 = vld [vmem:[%s1808_s26 + $0x8] sm:$0xff]  ;;  %v1456_v10 = vld [vmem:[%s1808_s26 + $0x18] sm:$0xff] }
  0x1a   : > { %1319 = vmatmul.msk.bf16.vlgmr.msra.gmra.mxu2 %vm507_vm0, %v1457_v3  ;;  %1322 = vmatmul.msk.bf16.vlgmr.msra.gmra.mxu3 %vm507_vm0, %v1460_v4  ;;  %v1458_v11 = vld [vmem:[%s1808_s26 + $0x28] sm:$0xff]  ;;  %v1459_v13 = vld [vmem:[%s1808_s26 + $0x30] sm:$0xff]  ;;  %v1473_v1 = vld [vmem:[%s1987_s5 + $0x18] sm:$0xff] }
  0x1b   : > { %674 = vmatpush.bf16.msrb.mxu1 %v1468_v6  ;;  %v1472_v2 = vld [vmem:[%s1987_s5 + $0x10] sm:$0xff] }
  0x1c   : > { %815 = vmatpush.bf16.msrb.mxu2 %v1476_v56 }
  0x1f   : > { %675 = vmatpush.bf16.msrb.mxu1 %v1467_v7 }
  0x20   : > { %816 = vmatpush.bf16.msrb.mxu2 %v1475_v57 }
  0x23   : > { %676 = vmatpush.bf16.msrb.mxu1 %v1466_v8 }
  0x24   : > { %817 = vmatpush.bf16.msrb.mxu2 %v1474_v60 }
  0x27   : > { %677 = vmatpush.bf16.msrb.mxu1 %v1465_v12 }
  0x28   : > { %818 = vmatpush.bf16.msrb.mxu2 %v1473_v1 }
  0x29   : > { %1316 = vmatmul.msk.bf16.gmra.mxu0 %vm507_vm0, %v1454_v9  ;;  %1318 = vmatmul.msk.bf16.gmra.mxu1 %vm507_vm0, %v1456_v10  ;;  %v1471_v10 = vld [vmem:[%s1987_s5 + $0x8] sm:$0xff] }
  0x2a   : > { %1320 = vmatmul.msk.bf16.gmra.mxu2 %vm507_vm0, %v1458_v11 }
  0x2b   : > { %678 = vmatpush.bf16.msrb.mxu1 %v1464_v14  ;;  %v1470_v14 = vld [vmem:[%s1987_s5] sm:$0xff] }
  0x2c   : > { %819 = vmatpush.bf16.msrb.mxu2 %v1472_v2 }
  0x2f   : > { %679 = vmatpush.bf16.msrb.mxu1 %v1463_v15 }
  0x30   : > { %820 = vmatpush.bf16.msrb.mxu2 %v1471_v10  ;;  %v1480_v10 = vld [vmem:[%s1989_s7 + $0x10] sm:$0xff] }
  0x33   : > { %680 = vmatpush.bf16.msrb.mxu1 %v1462_v16 }
  0x34   : > { %821 = vmatpush.bf16.msrb.mxu2 %v1470_v14 }
  0x3a   : > { %1321 = vmatmul.msk.bf16.gmra.mxu2 %vm507_vm0, %v1459_v13 }
  0x96   : > { %v541_v17 = vpop.f32.mrf.mxu0  ;;  %v551_v26 = vpop.f32.mrf.mxu1 }
  0x97   : > { %v542_v19 = vadd.f32 %v1850_v18, %v541_v17  ;;  %v552_v34 = vadd.f32 %v1850_v18, %v551_v26 }
  0x99   : > { %v581_v22 = vmax.f32 %v542_v19, 0.0  ;;  %v585_v37 = vmax.f32 %v552_v34, 0.0 }
  0x9d   : > { %v561_v40 = vpop.f32.mrf.mxu2  ;;  %v576_v6 = vpop.f32.mrf.mxu3 }
  0x9e   : > { %v543_v20 = vpop.f32.mrf.mxu0  ;;  %v553_v33 = vpop.f32.mrf.mxu1  ;;  %v562_v50 = vadd.f32 %v1850_v18, %v561_v40  ;;  %v577_v12 = vadd.f32 %v1850_v18, %v576_v6 }
  0x9f   : > { %v544_v21 = vadd.f32 %v1850_v18, %v543_v20  ;;  %v554_v35 = vadd.f32 %v1850_v18, %v553_v33  ;;  %v1895_v20 = vld [vmem:[%s1986_s4] ss:$0 sm:$0xff] }
  0xa0   : > { %v589_v52 = vmax.f32 %v562_v50, 0.0  ;;  %v595_v15 = vmax.f32 %v577_v12, 0.0 }
  0xa1   : > { %v582_v23 = vmax.f32 %v544_v21, 0.0  ;;  %v586_v38 = vmax.f32 %v554_v35, 0.0 }
  0xa3   : > { %v597_v24 = vpack.c.bf16 %v582_v23, %v581_v22  ;;  %v599_v39 = vpack.c.bf16 %v586_v38, %v585_v37 }
  0xa5   : > { %681 = vmatmul.bf16.vlgmr.msrb.gmra.mxu1 %v597_v24  ;;  %v563_v46 = vpop.f32.mrf.mxu2  ;;  %v578_v11 = vpop.f32.mrf.mxu3 }
  0xa6   : > { %v546_v25 = vpop.f32.mrf.mxu0  ;;  %v556_v36 = vpop.f32.mrf.mxu1  ;;  %v564_v51 = vadd.f32 %v1850_v18, %v563_v46  ;;  %v579_v13 = vadd.f32 %v1850_v18, %v578_v11 }
  0xa7   : > { %v547_v27 = vadd.f32 %v1850_v18, %v546_v25  ;;  %v557_v42 = vadd.f32 %v1850_v18, %v556_v36 }
  0xa8   : > { %v590_v53 = vmax.f32 %v564_v51, 0.0  ;;  %v596_v16 = vmax.f32 %v579_v13, 0.0  ;;  %v1479_v13 = vld [vmem:[%s1989_s7 + $0x8] sm:$0xff] }
  0xa9   : > { %v583_v30 = vmax.f32 %v547_v27, 0.0  ;;  %v587_v44 = vmax.f32 %v557_v42, 0.0 }
  0xaa   : > { %v601_v54 = vpack.c.bf16 %v590_v53, %v589_v52  ;;  %v604_v17 = vpack.c.bf16 %v596_v16, %v595_v15 }
  0xad   : > { %v566_v49 = vpop.f32.mrf.mxu2 }
  0xae   : > { %v548_v28 = vpop.f32.mrf.mxu0  ;;  %v558_v41 = vpop.f32.mrf.mxu1  ;;  %v567_v58 = vadd.f32 %v1850_v18, %v566_v49 }
  0xaf   : > { %v549_v29 = vadd.f32 %v1850_v18, %v548_v28  ;;  %v559_v43 = vadd.f32 %v1850_v18, %v558_v41 }
  0xb0   : > { %v591_v62 = vmax.f32 %v567_v58, 0.0 }
  0xb1   : > { %v584_v31 = vmax.f32 %v549_v29, 0.0  ;;  %v588_v45 = vmax.f32 %v559_v43, 0.0 }
  0xb3   : > { %v598_v32 = vpack.c.bf16 %v584_v31, %v583_v30  ;;  %v600_v47 = vpack.c.bf16 %v588_v45, %v587_v44 }
  0xb5   : > { %686 = vmatmul.bf16.gmra.mxu1 %v598_v32  ;;  %v568_v55 = vpop.f32.mrf.mxu2 }
  0xb6   : > { %v569_v59 = vadd.f32 %v1850_v18, %v568_v55 }
  0xb8   : > { %v592_v63 = vmax.f32 %v569_v59, 0.0 }
  0xba   : > { %v602_v0 = vpack.c.bf16 %v592_v63, %v591_v62  ;;  %v1484_v63 = vld [vmem:[%s1989_s7 + $0x30] sm:$0xff] }
  0xbd   : > { %v571_v61 = vpop.f32.mrf.mxu2 }
  0xbe   : > { %v572_v4 = vadd.f32 %v1850_v18, %v571_v61  ;;  %v1485_v61 = vld [vmem:[%s1989_s7 + $0x38] sm:$0xff] }
  0xbf   : > { %955 = vmatpush.bf16.msrb.mxu3 %v1485_v61 }
  0xc0   : > { %v593_v7 = vmax.f32 %v572_v4, 0.0  ;;  %v1482_v4 = vld [vmem:[%s1989_s7 + $0x20] sm:$0xff] }
  0xc3   : > { %956 = vmatpush.bf16.msrb.mxu3 %v1484_v63 }
  0xc5   : > { %691 = vmatmul.bf16.gmra.mxu1 %v599_v39  ;;  %v573_v3 = vpop.f32.mrf.mxu2 }
  0xc6   : > { %v574_v5 = vadd.f32 %v1850_v18, %v573_v3 }
  0xc8   : > { %v594_v8 = vmax.f32 %v574_v5, 0.0 }
  0xca   : > { %v603_v9 = vpack.c.bf16 %v594_v8, %v593_v7 }
  0xd5   : > { %696 = vmatmul.bf16.gmra.mxu1 %v600_v47 }
  0xe5   : > { %701 = vmatmul.bf16.gmra.mxu1 %v601_v54 }
  0xf5   : > { %706 = vmatmul.bf16.gmra.mxu1 %v602_v0  ;;  %v1483_v0 = vld [vmem:[%s1989_s7 + $0x28] sm:$0xff] }
  0xf6   : > { %957 = vmatpush.bf16.msrb.mxu3 %v1483_v0  ;;  %v1492_v0 = vld [vmem:[#allocation6 + $0x30] sm:$0xff] }
  0xfa   : > { %958 = vmatpush.bf16.msrb.mxu3 %v1482_v4 }
 0x105   : > { %711 = vmatmul.bf16.gmra.mxu1 %v603_v9  ;;  %v1481_v9 = vld [vmem:[%s1989_s7 + $0x18] sm:$0xff] }
 0x106   : > { %959 = vmatpush.bf16.msrb.mxu3 %v1481_v9  ;;  %v1489_v9 = vld [vmem:[#allocation6 + $0x18] sm:$0xff] }
 0x10a   : > { %960 = vmatpush.bf16.msrb.mxu3 %v1480_v10 }
 0x10e   : > { %961 = vmatpush.bf16.msrb.mxu3 %v1479_v13 }
 0x115   : > { %716 = vmatmul.bf16.gmra.mxu1 %v604_v17  ;;  %v1478_v17 = vld [vmem:[%s1989_s7] sm:$0xff] }
 0x116   : > { %962 = vmatpush.bf16.msrb.mxu3 %v1478_v17 }
 0x122   : > { %v682_v19 = vpop.f32.mrf.mxu1 }
 0x123   : > { %v683_v21 = vadd.f32 %v1895_v20, %v682_v19 }
 0x125   : > { %v722_v23 = vmax.f32 %v683_v21, 0.0 }
 0x12a   : > { %v684_v22 = vpop.f32.mrf.mxu1 }
 0x12b   : > { %v685_v18 = vadd.f32 %v1895_v20, %v684_v22  ;;  %v1940_v22 = vld [vmem:[%s1988_s6] ss:$0 sm:$0xff] }
 0x12d   : > { %v723_v24 = vmax.f32 %v685_v18, 0.0 }
 0x12f   : > { %v738_v25 = vpack.c.bf16 %v723_v24, %v722_v23 }
 0x131   : > { %822 = vmatmul.bf16.vlgmr.msrb.gmra.mxu2 %v738_v25 }
 0x132   : > { %v687_v26 = vpop.f32.mrf.mxu1 }
 0x133   : > { %v688_v27 = vadd.f32 %v1895_v20, %v687_v26 }
 0x135   : > { %v724_v30 = vmax.f32 %v688_v27, 0.0 }
 0x13a   : > { %v689_v28 = vpop.f32.mrf.mxu1 }
 0x13b   : > { %v690_v29 = vadd.f32 %v1895_v20, %v689_v28 }
 0x13d   : > { %v725_v31 = vmax.f32 %v690_v29, 0.0 }
 0x13f   : > { %v739_v32 = vpack.c.bf16 %v725_v31, %v724_v30 }
 0x141   : > { %827 = vmatmul.bf16.gmra.mxu2 %v739_v32 }
 0x142   : > { %v692_v33 = vpop.f32.mrf.mxu1 }
 0x143   : > { %v693_v34 = vadd.f32 %v1895_v20, %v692_v33 }
 0x145   : > { %v726_v37 = vmax.f32 %v693_v34, 0.0 }
 0x14a   : > { %v694_v35 = vpop.f32.mrf.mxu1 }
 0x14b   : > { %v695_v36 = vadd.f32 %v1895_v20, %v694_v35 }
 0x14d   : > { %v727_v38 = vmax.f32 %v695_v36, 0.0 }
 0x14f   : > { %v740_v39 = vpack.c.bf16 %v727_v38, %v726_v37 }
 0x151   : > { %832 = vmatmul.bf16.gmra.mxu2 %v740_v39 }
 0x152   : > { %v697_v40 = vpop.f32.mrf.mxu1 }
 0x153   : > { %v698_v41 = vadd.f32 %v1895_v20, %v697_v40 }
 0x155   : > { %v728_v44 = vmax.f32 %v698_v41, 0.0 }
 0x15a   : > { %v699_v42 = vpop.f32.mrf.mxu1 }
 0x15b   : > { %v700_v43 = vadd.f32 %v1895_v20, %v699_v42 }
 0x15d   : > { %v729_v45 = vmax.f32 %v700_v43, 0.0 }
 0x15f   : > { %v741_v46 = vpack.c.bf16 %v729_v45, %v728_v44 }
 0x161   : > { %837 = vmatmul.bf16.gmra.mxu2 %v741_v46 }
 0x162   : > { %v702_v47 = vpop.f32.mrf.mxu1 }
 0x163   : > { %v703_v48 = vadd.f32 %v1895_v20, %v702_v47 }
 0x165   : > { %v730_v51 = vmax.f32 %v703_v48, 0.0 }
 0x16a   : > { %v704_v49 = vpop.f32.mrf.mxu1 }
 0x16b   : > { %v705_v50 = vadd.f32 %v1895_v20, %v704_v49 }
 0x16d   : > { %v731_v52 = vmax.f32 %v705_v50, 0.0 }
 0x16f   : > { %v742_v53 = vpack.c.bf16 %v731_v52, %v730_v51 }
 0x171   : > { %842 = vmatmul.bf16.gmra.mxu2 %v742_v53 }
 0x172   : > { %v707_v54 = vpop.f32.mrf.mxu1 }
 0x173   : > { %v708_v55 = vadd.f32 %v1895_v20, %v707_v54 }
 0x175   : > { %v732_v58 = vmax.f32 %v708_v55, 0.0 }
 0x17a   : > { %v709_v56 = vpop.f32.mrf.mxu1 }
 0x17b   : > { %v710_v57 = vadd.f32 %v1895_v20, %v709_v56 }
 0x17d   : > { %v733_v59 = vmax.f32 %v710_v57, 0.0 }
 0x17f   : > { %v743_v60 = vpack.c.bf16 %v733_v59, %v732_v58 }
 0x181   : > { %847 = vmatmul.bf16.gmra.mxu2 %v743_v60 }
 0x182   : > { %v712_v62 = vpop.f32.mrf.mxu1 }
 0x183   : > { %v713_v1 = vadd.f32 %v1895_v20, %v712_v62  ;;  %v1493_v62 = vld [vmem:[#allocation6 + $0x38] sm:$0xff] }
 0x184   : > { %1096 = vmatpush.bf16.msrb.mxu0 %v1493_v62 }
 0x185   : > { %v734_v5 = vmax.f32 %v713_v1, 0.0  ;;  %v1491_v1 = vld [vmem:[#allocation6 + $0x28] sm:$0xff] }
 0x188   : > { %1097 = vmatpush.bf16.msrb.mxu0 %v1492_v0 }
 0x18a   : > { %v714_v2 = vpop.f32.mrf.mxu1 }
 0x18b   : > { %v715_v3 = vadd.f32 %v1895_v20, %v714_v2 }
 0x18c   : > { %1098 = vmatpush.bf16.msrb.mxu0 %v1491_v1 }
 0x18d   : > { %v735_v6 = vmax.f32 %v715_v3, 0.0 }
 0x18f   : > { %v744_v7 = vpack.c.bf16 %v735_v6, %v734_v5  ;;  %v1490_v5 = vld [vmem:[#allocation6 + $0x20] sm:$0xff] }
 0x190   : > { %1099 = vmatpush.bf16.msrb.mxu0 %v1490_v5 }
 0x191   : > { %852 = vmatmul.bf16.gmra.mxu2 %v744_v7 }
 0x192   : > { %v717_v8 = vpop.f32.mrf.mxu1 }
 0x193   : > { %v718_v11 = vadd.f32 %v1895_v20, %v717_v8 }
 0x194   : > { %1100 = vmatpush.bf16.msrb.mxu0 %v1489_v9 }
 0x195   : > { %v736_v15 = vmax.f32 %v718_v11, 0.0  ;;  %v1488_v11 = vld [vmem:[#allocation6 + $0x10] sm:$0xff] }
 0x198   : > { %1101 = vmatpush.bf16.msrb.mxu0 %v1488_v11 }
 0x19a   : > { %v719_v12 = vpop.f32.mrf.mxu1 }
 0x19b   : > { %v720_v14 = vadd.f32 %v1895_v20, %v719_v12  ;;  %v1487_v12 = vld [vmem:[#allocation6 + $0x8] sm:$0xff] }
 0x19c   : > { %1102 = vmatpush.bf16.msrb.mxu0 %v1487_v12 }
 0x19d   : > { %v737_v16 = vmax.f32 %v720_v14, 0.0 }
 0x19f   : > { %v745_v19 = vpack.c.bf16 %v737_v16, %v736_v15 }
 0x1a1   : > { %857 = vmatmul.bf16.gmra.mxu2 %v745_v19  ;;  %v1486_v19 = vld [vmem:[#allocation6] sm:$0xff] }
 0x1a2   : > { %1103 = vmatpush.bf16.msrb.mxu0 %v1486_v19 }
 0x1b4   : > { %v823_v21 = vpop.f32.mrf.mxu2 }
 0x1b5   : > { %v824_v18 = vadd.f32 %v1940_v22, %v823_v21 }
 0x1b7   : > { %v863_v24 = vmax.f32 %v824_v18, 0.0 }
 0x1bc   : > { %v825_v23 = vpop.f32.mrf.mxu2 }
 0x1bd   : > { %v826_v20 = vadd.f32 %v1940_v22, %v825_v23  ;;  %v1588_v23 = vld [vmem:[%s1990_s8] ss:$0 sm:$0xff] }
 0x1bf   : > { %v864_v25 = vmax.f32 %v826_v20, 0.0 }
 0x1c1   : > { %v879_v26 = vpack.c.bf16 %v864_v25, %v863_v24 }
 0x1c3   : > { %963 = vmatmul.bf16.vlgmr.msrb.gmra.mxu3 %v879_v26 }
 0x1c4   : > { %v828_v27 = vpop.f32.mrf.mxu2 }
 0x1c5   : > { %v829_v28 = vadd.f32 %v1940_v22, %v828_v27 }
 0x1c7   : > { %v865_v31 = vmax.f32 %v829_v28, 0.0 }
 0x1cc   : > { %v830_v29 = vpop.f32.mrf.mxu2 }
 0x1cd   : > { %v831_v30 = vadd.f32 %v1940_v22, %v830_v29 }
 0x1cf   : > { %v866_v32 = vmax.f32 %v831_v30, 0.0 }
 0x1d1   : > { %v880_v33 = vpack.c.bf16 %v866_v32, %v865_v31 }
 0x1d3   : > { %968 = vmatmul.bf16.gmra.mxu3 %v880_v33 }
 0x1d4   : > { %v833_v34 = vpop.f32.mrf.mxu2 }
 0x1d5   : > { %v834_v35 = vadd.f32 %v1940_v22, %v833_v34 }
 0x1d7   : > { %v867_v38 = vmax.f32 %v834_v35, 0.0 }
 0x1dc   : > { %v835_v36 = vpop.f32.mrf.mxu2 }
 0x1dd   : > { %v836_v37 = vadd.f32 %v1940_v22, %v835_v36 }
 0x1df   : > { %v868_v39 = vmax.f32 %v836_v37, 0.0 }
 0x1e1   : > { %v881_v40 = vpack.c.bf16 %v868_v39, %v867_v38 }
 0x1e3   : > { %973 = vmatmul.bf16.gmra.mxu3 %v881_v40 }
 0x1e4   : > { %v838_v41 = vpop.f32.mrf.mxu2 }
 0x1e5   : > { %v839_v42 = vadd.f32 %v1940_v22, %v838_v41 }
 0x1e7   : > { %v869_v45 = vmax.f32 %v839_v42, 0.0 }
 0x1ec   : > { %v840_v43 = vpop.f32.mrf.mxu2 }
 0x1ed   : > { %v841_v44 = vadd.f32 %v1940_v22, %v840_v43 }
 0x1ef   : > { %v870_v46 = vmax.f32 %v841_v44, 0.0 }
 0x1f1   : > { %v882_v47 = vpack.c.bf16 %v870_v46, %v869_v45 }
 0x1f3   : > { %978 = vmatmul.bf16.gmra.mxu3 %v882_v47 }
 0x1f4   : > { %v843_v48 = vpop.f32.mrf.mxu2 }
 0x1f5   : > { %v844_v49 = vadd.f32 %v1940_v22, %v843_v48 }
 0x1f7   : > { %v871_v52 = vmax.f32 %v844_v49, 0.0 }
 0x1fc   : > { %v845_v50 = vpop.f32.mrf.mxu2 }
 0x1fd   : > { %v846_v51 = vadd.f32 %v1940_v22, %v845_v50 }
 0x1ff   : > { %v872_v53 = vmax.f32 %v846_v51, 0.0 }
 0x201   : > { %v883_v54 = vpack.c.bf16 %v872_v53, %v871_v52 }
 0x203   : > { %983 = vmatmul.bf16.gmra.mxu3 %v883_v54 }
 0x204   : > { %v848_v55 = vpop.f32.mrf.mxu2 }
 0x205   : > { %v849_v56 = vadd.f32 %v1940_v22, %v848_v55 }
 0x207   : > { %v873_v59 = vmax.f32 %v849_v56, 0.0 }
 0x20c   : > { %v850_v57 = vpop.f32.mrf.mxu2 }
 0x20d   : > { %v851_v58 = vadd.f32 %v1940_v22, %v850_v57 }
 0x20f   : > { %v874_v60 = vmax.f32 %v851_v58, 0.0 }
 0x211   : > { %v884_v61 = vpack.c.bf16 %v874_v60, %v873_v59 }
 0x213   : > { %988 = vmatmul.bf16.gmra.mxu3 %v884_v61 }
 0x214   : > { %v853_v63 = vpop.f32.mrf.mxu2 }
 0x215   : > { %v854_v2 = vadd.f32 %v1940_v22, %v853_v63 }
 0x217   : > { %v875_v6 = vmax.f32 %v854_v2, 0.0 }
 0x21c   : > { %v855_v3 = vpop.f32.mrf.mxu2 }
 0x21d   : > { %v856_v4 = vadd.f32 %v1940_v22, %v855_v3 }
 0x21f   : > { %v876_v7 = vmax.f32 %v856_v4, 0.0 }
 0x221   : > { %v885_v8 = vpack.c.bf16 %v876_v7, %v875_v6 }
 0x223   : > { %993 = vmatmul.bf16.gmra.mxu3 %v885_v8 }
 0x224   : > { %v858_v10 = vpop.f32.mrf.mxu2 }
 0x225   : > { %v859_v13 = vadd.f32 %v1940_v22, %v858_v10 }
 0x227   : > { %v877_v16 = vmax.f32 %v859_v13, 0.0 }
 0x22c   : > { %v860_v14 = vpop.f32.mrf.mxu2 }
 0x22d   : > { %v861_v15 = vadd.f32 %v1940_v22, %v860_v14  ;;  %v1589_v14 = vld [vmem:[%s1992_s10] ss:$0 sm:$0xff] }
 0x22f   : > { %v878_v17 = vmax.f32 %v861_v15, 0.0 }
 0x231   : > { %v886_v21 = vpack.c.bf16 %v878_v17, %v877_v16 }
 0x233   : > { %998 = vmatmul.bf16.gmra.mxu3 %v886_v21 }
 0x246   : > { %v964_v18 = vpop.f32.mrf.mxu3 }
 0x247   : > { %v965_v20 = vadd.f32 %v1588_v23, %v964_v18 }
 0x249   : > { %v1004_v26 = vmax.f32 %v965_v20, 0.0 }
 0x24e   : > { %v966_v24 = vpop.f32.mrf.mxu3 }
 0x24f   : > { %v967_v25 = vadd.f32 %v1588_v23, %v966_v24 }
 0x251   : > { %v1005_v27 = vmax.f32 %v967_v25, 0.0 }
 0x253   : > { %v1020_v28 = vpack.c.bf16 %v1005_v27, %v1004_v26 }
 0x255   : > { %1104 = vmatmul.bf16.vlgmr.msrb.gmra.mxu0 %v1020_v28 }
 0x256   : > { %v969_v22 = vpop.f32.mrf.mxu3 }
 0x257   : > { %v970_v29 = vadd.f32 %v1588_v23, %v969_v22 }
 0x259   : > { %v1006_v32 = vmax.f32 %v970_v29, 0.0 }
 0x25e   : > { %v971_v30 = vpop.f32.mrf.mxu3 }
 0x25f   : > { %v972_v31 = vadd.f32 %v1588_v23, %v971_v30 }
 0x261   : > { %v1007_v33 = vmax.f32 %v972_v31, 0.0 }
 0x263   : > { %v1021_v34 = vpack.c.bf16 %v1007_v33, %v1006_v32 }
 0x265   : > { %1109 = vmatmul.bf16.gmra.mxu0 %v1021_v34 }
 0x266   : > { %v974_v35 = vpop.f32.mrf.mxu3 }
 0x267   : > { %v975_v36 = vadd.f32 %v1588_v23, %v974_v35 }
 0x269   : > { %v1008_v39 = vmax.f32 %v975_v36, 0.0 }
 0x26e   : > { %v976_v37 = vpop.f32.mrf.mxu3 }
 0x26f   : > { %v977_v38 = vadd.f32 %v1588_v23, %v976_v37 }
 0x271   : > { %v1009_v40 = vmax.f32 %v977_v38, 0.0 }
 0x273   : > { %v1022_v41 = vpack.c.bf16 %v1009_v40, %v1008_v39 }
 0x275   : > { %1114 = vmatmul.bf16.gmra.mxu0 %v1022_v41 }
 0x276   : > { %v979_v42 = vpop.f32.mrf.mxu3 }
 0x277   : > { %v980_v43 = vadd.f32 %v1588_v23, %v979_v42 }
 0x279   : > { %v1010_v46 = vmax.f32 %v980_v43, 0.0 }
 0x27e   : > { %v981_v44 = vpop.f32.mrf.mxu3 }
 0x27f   : > { %v982_v45 = vadd.f32 %v1588_v23, %v981_v44 }
 0x281   : > { %v1011_v47 = vmax.f32 %v982_v45, 0.0 }
 0x283   : > { %v1023_v48 = vpack.c.bf16 %v1011_v47, %v1010_v46 }
 0x285   : > { %1119 = vmatmul.bf16.gmra.mxu0 %v1023_v48 }
 0x286   : > { %v984_v49 = vpop.f32.mrf.mxu3 }
 0x287   : > { %v985_v50 = vadd.f32 %v1588_v23, %v984_v49 }
 0x289   : > { %v1012_v53 = vmax.f32 %v985_v50, 0.0 }
 0x28e   : > { %v986_v51 = vpop.f32.mrf.mxu3 }
 0x28f   : > { %v987_v52 = vadd.f32 %v1588_v23, %v986_v51 }
 0x291   : > { %v1013_v54 = vmax.f32 %v987_v52, 0.0 }
 0x293   : > { %v1024_v55 = vpack.c.bf16 %v1013_v54, %v1012_v53 }
 0x295   : > { %1124 = vmatmul.bf16.gmra.mxu0 %v1024_v55 }
 0x296   : > { %v989_v56 = vpop.f32.mrf.mxu3 }
 0x297   : > { %v990_v57 = vadd.f32 %v1588_v23, %v989_v56 }
 0x299   : > { %v1014_v60 = vmax.f32 %v990_v57, 0.0 }
 0x29e   : > { %v991_v58 = vpop.f32.mrf.mxu3 }
 0x29f   : > { %v992_v59 = vadd.f32 %v1588_v23, %v991_v58 }
 0x2a1   : > { %v1015_v61 = vmax.f32 %v992_v59, 0.0 }
 0x2a3   : > { %v1025_v62 = vpack.c.bf16 %v1015_v61, %v1014_v60 }
 0x2a5   : > { %1129 = vmatmul.bf16.gmra.mxu0 %v1025_v62 }
 0x2a6   : > { %v994_v63 = vpop.f32.mrf.mxu3 }
 0x2a7   : > { %v995_v0 = vadd.f32 %v1588_v23, %v994_v63 }
 0x2a9   : > { %v1016_v3 = vmax.f32 %v995_v0, 0.0 }
 0x2ae   : > { %v996_v1 = vpop.f32.mrf.mxu3 }
 0x2af   : > { %v997_v2 = vadd.f32 %v1588_v23, %v996_v1 }
 0x2b1   : > { %v1017_v4 = vmax.f32 %v997_v2, 0.0 }
 0x2b3   : > { %v1026_v5 = vpack.c.bf16 %v1017_v4, %v1016_v3 }
 0x2b5   : > { %1134 = vmatmul.bf16.gmra.mxu0 %v1026_v5 }
 0x2b6   : > { %v999_v6 = vpop.f32.mrf.mxu3 }
 0x2b7   : > { %v1000_v7 = vadd.f32 %v1588_v23, %v999_v6 }
 0x2b9   : > { %v1018_v10 = vmax.f32 %v1000_v7, 0.0 }
 0x2be   : > { %v1001_v8 = vpop.f32.mrf.mxu3 }
 0x2bf   : > { %v1002_v9 = vadd.f32 %v1588_v23, %v1001_v8 }
 0x2c1   : > { %v1019_v11 = vmax.f32 %v1002_v9, 0.0 }
 0x2c3   : > { %v1027_v12 = vpack.c.bf16 %v1019_v11, %v1018_v10 }
 0x2c5   : > { %1139 = vmatmul.bf16.gmra.mxu0 %v1027_v12 }
 0x2d2   : > { %v1105_v13 = vpop.f32.mrf.mxu0 }
 0x2d3   : > { %v1106_v16 = vadd.f32 %v1589_v14, %v1105_v13 }
 0x2da   : > { %v1107_v15 = vpop.f32.mrf.mxu0 }
 0x2db   : > { %v1108_v17 = vadd.f32 %v1589_v14, %v1107_v15 }
 0x2dd   : > { %v1497_v19 = vpack.c.bf16 %v1108_v17, %v1106_v16 }
 0x2df   : > { %1498 = vst [vmem:[%s1969_s16] sm:$0xff] %v1497_v19  }
 0x2e2   : > { %v1110_v21 = vpop.f32.mrf.mxu0 }
 0x2e3   : > { %v1111_v23 = vadd.f32 %v1589_v14, %v1110_v21 }
 0x2ea   : > { %v1112_v18 = vpop.f32.mrf.mxu0 }
 0x2eb   : > { %v1113_v20 = vadd.f32 %v1589_v14, %v1112_v18 }
 0x2ed   : > { %v1502_v24 = vpack.c.bf16 %v1113_v20, %v1111_v23 }
 0x2ef   : > { %1534 = vst [vmem:[%s1969_s16 + $0x8] sm:$0xff] %v1502_v24  }
 0x2f2   : > { %v1115_v25 = vpop.f32.mrf.mxu0 }
 0x2f3   : > { %v1116_v27 = vadd.f32 %v1589_v14, %v1115_v25 }
 0x2fa   : > { %v1117_v26 = vpop.f32.mrf.mxu0 }
 0x2fb   : > { %v1118_v28 = vadd.f32 %v1589_v14, %v1117_v26 }
 0x2fd   : > { %v1507_v22 = vpack.c.bf16 %v1118_v28, %v1116_v27 }
 0x2ff   : > { %1535 = vst [vmem:[%s1969_s16 + $0x10] sm:$0xff] %v1507_v22  }
 0x302   : > { %v1120_v29 = vpop.f32.mrf.mxu0 }
 0x303   : > { %v1121_v31 = vadd.f32 %v1589_v14, %v1120_v29 }
 0x30a   : > { %v1122_v30 = vpop.f32.mrf.mxu0 }
 0x30b   : > { %v1123_v32 = vadd.f32 %v1589_v14, %v1122_v30 }
 0x30d   : > { %v1512_v33 = vpack.c.bf16 %v1123_v32, %v1121_v31 }
 0x30f   : > { %1536 = vst [vmem:[%s1969_s16 + $0x18] sm:$0xff] %v1512_v33  }
 0x312   : > { %v1125_v34 = vpop.f32.mrf.mxu0 }
 0x313   : > { %v1126_v36 = vadd.f32 %v1589_v14, %v1125_v34 }
 0x31a   : > { %v1127_v35 = vpop.f32.mrf.mxu0 }
 0x31b   : > { %v1128_v37 = vadd.f32 %v1589_v14, %v1127_v35 }
 0x31d   : > { %v1517_v38 = vpack.c.bf16 %v1128_v37, %v1126_v36 }
 0x31f   : > { %1537 = vst [vmem:[%s1969_s16 + $0x20] sm:$0xff] %v1517_v38  }
 0x322   : > { %v1130_v39 = vpop.f32.mrf.mxu0 }
 0x323   : > { %v1131_v41 = vadd.f32 %v1589_v14, %v1130_v39 }
 0x32a   : > { %v1132_v40 = vpop.f32.mrf.mxu0 }
 0x32b   : > { %v1133_v42 = vadd.f32 %v1589_v14, %v1132_v40 }
 0x32d   : > { %v1522_v43 = vpack.c.bf16 %v1133_v42, %v1131_v41 }
 0x32f   : > { %1538 = vst [vmem:[%s1969_s16 + $0x28] sm:$0xff] %v1522_v43  }
 0x332   : > { %v1135_v44 = vpop.f32.mrf.mxu0 }
 0x333   : > { %v1136_v46 = vadd.f32 %v1589_v14, %v1135_v44 }
 0x33a   : > { %v1137_v45 = vpop.f32.mrf.mxu0 }
 0x33b   : > { %v1138_v47 = vadd.f32 %v1589_v14, %v1137_v45 }
 0x33d   : > { %v1527_v48 = vpack.c.bf16 %v1138_v47, %v1136_v46 }
 0x33f   : > { %1539 = vst [vmem:[%s1969_s16 + $0x30] sm:$0xff] %v1527_v48  }
 0x342   : > { %v1140_v49 = vpop.f32.mrf.mxu0 }
 0x343   : > { %v1141_v51 = vadd.f32 %v1589_v14, %v1140_v49 }
 0x34a   : > { %v1142_v50 = vpop.f32.mrf.mxu0 }
 0x34b   : > { %v1143_v52 = vadd.f32 %v1589_v14, %v1142_v50 }
 0x34d   : > { %v1532_v53 = vpack.c.bf16 %v1143_v52, %v1141_v51 }
 0x34f   : > { %1540 = vst [vmem:[%s1969_s16 + $0x38] sm:$0xff] %v1532_v53  }
 0x350 PF: > { %s23_s17 = sadd.s32 1, %s1694_s17  }
 0x351   : > { %p20_p7 = scmp.ge.s32.totalorder %s23_s17, 4  }
 0x353   :  { %22 = sbr.rel (!%p20_p7) target bundleno = 2 (0x2), region = 107 }
 0x358   :  { %1199 = vsyncpa [#allocation3], 1 }
 0x359   :  { %1201 = vsyncpa [#allocation3 + $0x1], 1 }
 0x35a   :  { %1202 = vsyncpa [#allocation5], 1 }

</bundles_post_ra>
